<compile_context>
chip_gen: v6e
topology: v6e:2x2x1
jax: 0.10.0
libtpu: 0.0.40
codegen_flags: <defaults>
</compile_context>

<pallas_src>
import functools

import jax
import jax.numpy as jnp
from jax.experimental import pallas as pl
from jax.experimental.pallas import tpu as pltpu


# ----------------------------------------------------------------------------
# helpers
# ----------------------------------------------------------------------------
def _round_up(n, m):
    return ((n + m - 1) // m) * m


def _pad2(a, rows, cols):
    """Zero-pad a 2-D array up to [rows, cols]."""
    out = jnp.zeros((rows, cols), a.dtype)
    return out.at[: a.shape[0], : a.shape[1]].set(a)


def _leaky_relu(v, slope=0.2):
    return jnp.where(v > 0, v, slope * v)


# ----------------------------------------------------------------------------
# kernel
# ----------------------------------------------------------------------------
def vae_kernel(
    # batch-tiled inputs
    x_ref, eps_ref,
    # encoder params (resident)
    w_in_ref, b_in_ref, w_in2_ref, b_in2_ref, w_mv_ref, b_mv_ref,
    # decoder params (resident)
    dw_h_ref, db_h_ref, dw_h2_ref, db_h2_ref, w_out_ref, b_out_ref,
    # outputs
    xhat_ref, mv_ref,
    *, latent_dim,
):
    def mm(a, w_ref, b_ref):
        w = w_ref[...]
        return (
            jnp.dot(a.astype(w.dtype), w, preferred_element_type=jnp.float32)
            + b_ref[...]
        )

    x = x_ref[...]

    # ---------------- Encoder ----------------
    h = _leaky_relu(mm(x, w_in_ref, b_in_ref))
    h = _leaky_relu(mm(h, w_in2_ref, b_in2_ref))

    # fused mean / log_var head: lanes [0:L)=mean, [L:2L)=log_var, rest 0
    mv = mm(h, w_mv_ref, b_mv_ref)
    mv_ref[...] = mv.astype(mv_ref.dtype)          # lane-dense 128-wide store

    # ---------------- Reparameterization (packed lane layout) ----------------
    # z_packed: lanes [0:L) = mean, lanes [L:2L) = exp(0.5*log_var) * eps.
    # The decoder's first weight has the latent rows duplicated in both lane
    # groups, so z_packed @ dw_h == (mean + std*eps) @ W_latent.
    lane = jax.lax.broadcasted_iota(jnp.int32, mv.shape, 1)
    mean_part = jnp.where(lane < latent_dim, mv, 0.0)
    lv_part = jnp.where((lane >= latent_dim) & (lane < 2 * latent_dim), mv, 0.0)
    z_packed = mean_part + jnp.exp(0.5 * lv_part) * eps_ref[...]

    # ---------------- Decoder ----------------
    d = _leaky_relu(mm(z_packed, dw_h_ref, db_h_ref))
    d = _leaky_relu(mm(d, dw_h2_ref, db_h2_ref))
    logits = mm(d, w_out_ref, b_out_ref)
    xhat_ref[...] = jax.nn.sigmoid(logits).astype(xhat_ref.dtype)


# ----------------------------------------------------------------------------
# wrapper
# ----------------------------------------------------------------------------
@functools.partial(jax.jit, static_argnames=("batch_tile", "matmul_dtype"))
def vae_forward(x, eps, params, *, batch_tile=None, matmul_dtype=jnp.float32):
    """Full VAE forward.  Returns (x_hat, mean, log_var) (un-padded)."""
    f32 = jnp.float32
    B, input_dim = x.shape
    hidden_dim = params["w_in"].shape[1]
    latent_dim = params["w_mean"].shape[1]
    output_dim = params["w_out"].shape[1]

    # lane-aligned padded dims
    IN_P = _round_up(input_dim, 128)
    H_P = _round_up(hidden_dim, 128)
    MV_P = _round_up(2 * latent_dim, 128)
    OUT_P = _round_up(output_dim, 128)

    # pick the largest batch tile (whole batch for small B); pad batch if needed
    if batch_tile is None:
        for t in (256, 128, 64, 32, 16, 8):
            if B % t == 0:
                batch_tile = t
                break
        else:
            batch_tile = min(_round_up(B, 8), 256)
    B_p = _round_up(B, batch_tile)
    grid = (B_p // batch_tile,)

    # ---- pack / pad parameters (tiny; fused into the jitted graph) ----
    wdt = matmul_dtype
    w_in = _pad2(params["w_in"], IN_P, H_P).astype(wdt)
    b_in = _pad2(params["b_in"], 1, H_P).astype(f32)
    w_in2 = _pad2(params["w_in2"], H_P, H_P).astype(wdt)
    b_in2 = _pad2(params["b_in2"], 1, H_P).astype(f32)

    w_mv = jnp.zeros((H_P, MV_P), f32)
    w_mv = w_mv.at[:hidden_dim, :latent_dim].set(params["w_mean"])
    w_mv = w_mv.at[:hidden_dim, latent_dim:2 * latent_dim].set(params["w_var"])
    w_mv = w_mv.astype(wdt)
    b_mv = jnp.zeros((1, MV_P), f32)
    b_mv = b_mv.at[:, :latent_dim].set(params["b_mean"])
    b_mv = b_mv.at[:, latent_dim:2 * latent_dim].set(params["b_var"])

    # decoder first layer: duplicate latent rows so the packed z works directly
    dw_h = jnp.zeros((MV_P, H_P), f32)
    dw_h = dw_h.at[:latent_dim, :hidden_dim].set(params["dw_h"])
    dw_h = dw_h.at[latent_dim:2 * latent_dim, :hidden_dim].set(params["dw_h"])
    dw_h = dw_h.astype(wdt)
    db_h = _pad2(params["db_h"], 1, H_P).astype(f32)
    dw_h2 = _pad2(params["dw_h2"], H_P, H_P).astype(wdt)
    db_h2 = _pad2(params["db_h2"], 1, H_P).astype(f32)
    w_out = _pad2(params["w_out"], H_P, OUT_P).astype(wdt)
    b_out = _pad2(params["b_out"], 1, OUT_P).astype(f32)

    # ---- pad activations ----
    x_p = jnp.zeros((B_p, IN_P), f32).at[:B, :input_dim].set(x)
    eps_p = jnp.zeros((B_p, MV_P), f32).at[:B, latent_dim:2 * latent_dim].set(eps)

    # ---- specs ----
    def row_spec(cols):
        return pl.BlockSpec((batch_tile, cols), lambda i: (i, 0))

    def resident(arr):
        return pl.BlockSpec(arr.shape, lambda i: (0, 0))

    weights = (w_in, b_in, w_in2, b_in2, w_mv, b_mv,
               dw_h, db_h, dw_h2, db_h2, w_out, b_out)

    in_specs = [row_spec(IN_P), row_spec(MV_P)] + [resident(w) for w in weights]
    out_specs = [row_spec(OUT_P), row_spec(MV_P)]
    out_shape = [
        jax.ShapeDtypeStruct((B_p, OUT_P), f32),
        jax.ShapeDtypeStruct((B_p, MV_P), f32),
    ]

    xhat_p, mv_p = pl.pallas_call(
        functools.partial(vae_kernel, latent_dim=latent_dim),
        out_shape=out_shape,
        grid_spec=pl.GridSpec(grid=grid, in_specs=in_specs, out_specs=out_specs),
        compiler_params=pltpu.CompilerParams(
            dimension_semantics=("parallel",)),
    )(x_p, eps_p, *weights)

    x_hat = xhat_p[:B, :output_dim]
    mean = mv_p[:B, :latent_dim]
    log_var = mv_p[:B, latent_dim:2 * latent_dim]
    return x_hat, mean, log_var


# ----------------------------------------------------------------------------
# params / reference
# ----------------------------------------------------------------------------
def init_params(key, input_dim, hidden_dim, latent_dim, output_dim):
    """Deterministic init mimicking nn.Linear's uniform(-1/sqrt(fan_in), ...).
    Weights are stored transposed: [in_features, out_features]."""
    def linear(k, fan_in, fan_out):
        kw, kb = jax.random.split(k)
        bound = 1.0 / jnp.sqrt(fan_in)
        w = jax.random.uniform(kw, (fan_in, fan_out), jnp.float32, -bound, bound)
        b = jax.random.uniform(kb, (1, fan_out), jnp.float32, -bound, bound)
        return w, b

    keys = jax.random.split(key, 7)
    p = {}
    p["w_in"], p["b_in"] = linear(keys[0], input_dim, hidden_dim)
    p["w_in2"], p["b_in2"] = linear(keys[1], hidden_dim, hidden_dim)
    p["w_mean"], p["b_mean"] = linear(keys[2], hidden_dim, latent_dim)
    p["w_var"], p["b_var"] = linear(keys[3], hidden_dim, latent_dim)
    p["dw_h"], p["db_h"] = linear(keys[4], latent_dim, hidden_dim)
    p["dw_h2"], p["db_h2"] = linear(keys[5], hidden_dim, hidden_dim)
    p["w_out"], p["b_out"] = linear(keys[6], hidden_dim, output_dim)
    return p


def vae_ref(x, eps, p):
    """Pure-JAX reference of the same forward pass (unfused, unpadded)."""
    lr = lambda v: jnp.where(v > 0, v, 0.2 * v)
    h = lr(x @ p["w_in"] + p["b_in"])
    h = lr(h @ p["w_in2"] + p["b_in2"])
    mean = h @ p["w_mean"] + p["b_mean"]
    log_var = h @ p["w_var"] + p["b_var"]
    z = mean + jnp.exp(0.5 * log_var) * eps
    d = lr(z @ p["dw_h"] + p["db_h"])
    d = lr(d @ p["dw_h2"] + p["db_h2"])
    x_hat = jax.nn.sigmoid(d @ p["w_out"] + p["b_out"])
    return x_hat, mean, log_var


# ----------------------------------------------------------------------------
# main
# ----------------------------------------------------------------------------
if __name__ == "__main__":
    key = jax.random.PRNGKey(0)
    k_param, k_x, k_eps = jax.random.split(key, 3)

    # Small VAE: torch module operates on flat [B, input_dim] vectors.
    batch, input_dim, hidden_dim, latent_dim = 16, 64, 128, 32
    output_dim = input_dim

    params = init_params(k_param, input_dim, hidden_dim, latent_dim, output_dim)
    x = jax.random.normal(k_x, (batch, input_dim), jnp.float32)
    # deterministic stand-in for torch.randn_like(var)
    eps = jax.random.normal(k_eps, (batch, latent_dim), jnp.float32)

    # f32 matmuls (right shape for v5e; correctness baseline)
    x_hat, mean, log_var = vae_forward(x, eps, params)
    jax.block_until_ready((x_hat, mean, log_var))

    xr, mr, lvr = vae_ref(x, eps, params)
    assert jnp.allclose(x_hat, xr, atol=1e-5, rtol=1e-5)
    assert jnp.allclose(mean, mr, atol=1e-5, rtol=1e-5)
    assert jnp.allclose(log_var, lvr, atol=1e-5, rtol=1e-5)

    # bf16 matmuls (v6e / v7x recommendation): f32 accumulation + f32 epilogue,
    # loose tolerance vs. the f32 reference.
    xb, mb, lvb = vae_forward(x, eps, params, matmul_dtype=jnp.bfloat16)
    jax.block_until_ready((xb, mb, lvb))
    assert jnp.allclose(xb, xr, atol=1e-1, rtol=1e-1)
    assert jnp.allclose(mb, mr, atol=1e-1, rtol=1e-1)
    assert jnp.allclose(lvb, lvr, atol=1e-1, rtol=1e-1)

    print("KERNEL_OK")
</pallas_src>

<mosaic_0001>
module attributes {stable_mosaic.version = 11 : i64} {
  func.func @vae_kernel(%arg0: i32, %arg1: memref<16x128xf32, #tpu.memory_space<vmem>>, %arg2: memref<16x128xf32, #tpu.memory_space<vmem>>, %arg3: memref<128x128xf32, #tpu.memory_space<vmem>>, %arg4: memref<1x128xf32, #tpu.memory_space<vmem>>, %arg5: memref<128x128xf32, #tpu.memory_space<vmem>>, %arg6: memref<1x128xf32, #tpu.memory_space<vmem>>, %arg7: memref<128x128xf32, #tpu.memory_space<vmem>>, %arg8: memref<1x128xf32, #tpu.memory_space<vmem>>, %arg9: memref<128x128xf32, #tpu.memory_space<vmem>>, %arg10: memref<1x128xf32, #tpu.memory_space<vmem>>, %arg11: memref<128x128xf32, #tpu.memory_space<vmem>>, %arg12: memref<1x128xf32, #tpu.memory_space<vmem>>, %arg13: memref<128x128xf32, #tpu.memory_space<vmem>>, %arg14: memref<1x128xf32, #tpu.memory_space<vmem>>, %arg15: memref<16x128xf32, #tpu.memory_space<vmem>>, %arg16: memref<16x128xf32, #tpu.memory_space<vmem>>) attributes {dimension_semantics = [#tpu.dimension_semantics<parallel>], iteration_bounds = array<i64: 1>, scalar_prefetch = 0 : i64, scratch_operands = 0 : i64, tpu.core_type = #tpu.core_type<tc>, window_params = [{transform_indices = @transform_0, window_bounds = array<i64: 16, 128>}, {transform_indices = @transform_1, window_bounds = array<i64: 16, 128>}, {pipeline_mode = #tpu.pipeline_mode<synchronous>, transform_indices = @transform_2, window_bounds = array<i64: 128, 128>}, {pipeline_mode = #tpu.pipeline_mode<synchronous>, transform_indices = @transform_3, window_bounds = array<i64: 1, 128>}, {pipeline_mode = #tpu.pipeline_mode<synchronous>, transform_indices = @transform_4, window_bounds = array<i64: 128, 128>}, {pipeline_mode = #tpu.pipeline_mode<synchronous>, transform_indices = @transform_5, window_bounds = array<i64: 1, 128>}, {pipeline_mode = #tpu.pipeline_mode<synchronous>, transform_indices = @transform_6, window_bounds = array<i64: 128, 128>}, {pipeline_mode = #tpu.pipeline_mode<synchronous>, transform_indices = @transform_7, window_bounds = array<i64: 1, 128>}, {pipeline_mode = #tpu.pipeline_mode<synchronous>, transform_indices = @transform_8, window_bounds = array<i64: 128, 128>}, {pipeline_mode = #tpu.pipeline_mode<synchronous>, transform_indices = @transform_9, window_bounds = array<i64: 1, 128>}, {pipeline_mode = #tpu.pipeline_mode<synchronous>, transform_indices = @transform_10, window_bounds = array<i64: 128, 128>}, {pipeline_mode = #tpu.pipeline_mode<synchronous>, transform_indices = @transform_11, window_bounds = array<i64: 1, 128>}, {pipeline_mode = #tpu.pipeline_mode<synchronous>, transform_indices = @transform_12, window_bounds = array<i64: 128, 128>}, {pipeline_mode = #tpu.pipeline_mode<synchronous>, transform_indices = @transform_13, window_bounds = array<i64: 1, 128>}, {transform_indices = @transform_14, window_bounds = array<i64: 16, 128>}, {transform_indices = @transform_15, window_bounds = array<i64: 16, 128>}]} {
    %c0 = arith.constant 0 : index
    %c0_0 = arith.constant 0 : index
    %0 = vector.load %arg1[%c0, %c0_0] : memref<16x128xf32, #tpu.memory_space<vmem>>, vector<16x128xf32>
    %c0_1 = arith.constant 0 : index
    %c0_2 = arith.constant 0 : index
    %1 = vector.load %arg3[%c0_1, %c0_2] : memref<128x128xf32, #tpu.memory_space<vmem>>, vector<128x128xf32>
    %cst = arith.constant dense<0.000000e+00> : vector<16x128xf32>
    %2 = tpu.matmul %0, %1, %cst {dimension_numbers = #tpu.dot_dimension_numbers<[1], [0], [0], [1], [0, 0, 1, 1], [], []>} : vector<16x128xf32>, vector<128x128xf32>, vector<16x128xf32> -> vector<16x128xf32>
    %c0_3 = arith.constant 0 : index
    %c0_4 = arith.constant 0 : index
    %3 = vector.load %arg4[%c0_3, %c0_4] : memref<1x128xf32, #tpu.memory_space<vmem>>, vector<1x128xf32>
    %4 = vector.broadcast %3 : vector<1x128xf32> to vector<16x128xf32>
    %5 = arith.addf %2, %4 : vector<16x128xf32>
    %cst_5 = arith.constant 0.000000e+00 : f32
    %6 = vector.broadcast %cst_5 : f32 to vector<16x128xf32>
    %7 = arith.cmpf ogt, %5, %6 : vector<16x128xf32>
    %cst_6 = arith.constant 2.000000e-01 : f32
    %8 = vector.broadcast %cst_6 : f32 to vector<16x128xf32>
    %9 = arith.mulf %8, %5 : vector<16x128xf32>
    %10 = arith.select %7, %5, %9 : vector<16x128xi1>, vector<16x128xf32>
    %c0_7 = arith.constant 0 : index
    %c0_8 = arith.constant 0 : index
    %11 = vector.load %arg5[%c0_7, %c0_8] : memref<128x128xf32, #tpu.memory_space<vmem>>, vector<128x128xf32>
    %cst_9 = arith.constant dense<0.000000e+00> : vector<16x128xf32>
    %12 = tpu.matmul %10, %11, %cst_9 {dimension_numbers = #tpu.dot_dimension_numbers<[1], [0], [0], [1], [0, 0, 1, 1], [], []>} : vector<16x128xf32>, vector<128x128xf32>, vector<16x128xf32> -> vector<16x128xf32>
    %c0_10 = arith.constant 0 : index
    %c0_11 = arith.constant 0 : index
    %13 = vector.load %arg6[%c0_10, %c0_11] : memref<1x128xf32, #tpu.memory_space<vmem>>, vector<1x128xf32>
    %14 = vector.broadcast %13 : vector<1x128xf32> to vector<16x128xf32>
    %15 = arith.addf %12, %14 : vector<16x128xf32>
    %cst_12 = arith.constant 0.000000e+00 : f32
    %16 = vector.broadcast %cst_12 : f32 to vector<16x128xf32>
    %17 = arith.cmpf ogt, %15, %16 : vector<16x128xf32>
    %cst_13 = arith.constant 2.000000e-01 : f32
    %18 = vector.broadcast %cst_13 : f32 to vector<16x128xf32>
    %19 = arith.mulf %18, %15 : vector<16x128xf32>
    %20 = arith.select %17, %15, %19 : vector<16x128xi1>, vector<16x128xf32>
    %c0_14 = arith.constant 0 : index
    %c0_15 = arith.constant 0 : index
    %21 = vector.load %arg7[%c0_14, %c0_15] : memref<128x128xf32, #tpu.memory_space<vmem>>, vector<128x128xf32>
    %cst_16 = arith.constant dense<0.000000e+00> : vector<16x128xf32>
    %22 = tpu.matmul %20, %21, %cst_16 {dimension_numbers = #tpu.dot_dimension_numbers<[1], [0], [0], [1], [0, 0, 1, 1], [], []>} : vector<16x128xf32>, vector<128x128xf32>, vector<16x128xf32> -> vector<16x128xf32>
    %c0_17 = arith.constant 0 : index
    %c0_18 = arith.constant 0 : index
    %23 = vector.load %arg8[%c0_17, %c0_18] : memref<1x128xf32, #tpu.memory_space<vmem>>, vector<1x128xf32>
    %24 = vector.broadcast %23 : vector<1x128xf32> to vector<16x128xf32>
    %25 = arith.addf %22, %24 : vector<16x128xf32>
    %c0_19 = arith.constant 0 : index
    %c0_20 = arith.constant 0 : index
    %26 = vector.load %arg16[%c0_19, %c0_20] : memref<16x128xf32, #tpu.memory_space<vmem>>, vector<16x128xf32>
    tpu.vector_store %arg16[%c0_19, %c0_20], %25 {strides = array<i32>} : memref<16x128xf32, #tpu.memory_space<vmem>>, vector<16x128xf32>,
    %27 = tpu.iota {dimensions = array<i32: 1>} : vector<16x128xi32>
    %c32_i32 = arith.constant 32 : i32
    %28 = vector.broadcast %c32_i32 : i32 to vector<16x128xi32>
    %29 = arith.cmpi slt, %27, %28 : vector<16x128xi32>
    %cst_21 = arith.constant 0.000000e+00 : f32
    %30 = vector.broadcast %cst_21 : f32 to vector<16x128xf32>
    %31 = arith.select %29, %25, %30 : vector<16x128xi1>, vector<16x128xf32>
    %c32_i32_22 = arith.constant 32 : i32
    %32 = vector.broadcast %c32_i32_22 : i32 to vector<16x128xi32>
    %33 = arith.cmpi sge, %27, %32 : vector<16x128xi32>
    %c64_i32 = arith.constant 64 : i32
    %34 = vector.broadcast %c64_i32 : i32 to vector<16x128xi32>
    %35 = arith.cmpi slt, %27, %34 : vector<16x128xi32>
    %36 = arith.andi %33, %35 : vector<16x128xi1>
    %cst_23 = arith.constant 0.000000e+00 : f32
    %37 = vector.broadcast %cst_23 : f32 to vector<16x128xf32>
    %38 = arith.select %36, %25, %37 : vector<16x128xi1>, vector<16x128xf32>
    %cst_24 = arith.constant 5.000000e-01 : f32
    %39 = vector.broadcast %cst_24 : f32 to vector<16x128xf32>
    %40 = arith.mulf %39, %38 : vector<16x128xf32>
    %41 = math.exp %40 : vector<16x128xf32>
    %c0_25 = arith.constant 0 : index
    %c0_26 = arith.constant 0 : index
    %42 = vector.load %arg2[%c0_25, %c0_26] : memref<16x128xf32, #tpu.memory_space<vmem>>, vector<16x128xf32>
    %43 = arith.mulf %41, %42 : vector<16x128xf32>
    %44 = arith.addf %31, %43 : vector<16x128xf32>
    %c0_27 = arith.constant 0 : index
    %c0_28 = arith.constant 0 : index
    %45 = vector.load %arg9[%c0_27, %c0_28] : memref<128x128xf32, #tpu.memory_space<vmem>>, vector<128x128xf32>
    %cst_29 = arith.constant dense<0.000000e+00> : vector<16x128xf32>
    %46 = tpu.matmul %44, %45, %cst_29 {dimension_numbers = #tpu.dot_dimension_numbers<[1], [0], [0], [1], [0, 0, 1, 1], [], []>} : vector<16x128xf32>, vector<128x128xf32>, vector<16x128xf32> -> vector<16x128xf32>
    %c0_30 = arith.constant 0 : index
    %c0_31 = arith.constant 0 : index
    %47 = vector.load %arg10[%c0_30, %c0_31] : memref<1x128xf32, #tpu.memory_space<vmem>>, vector<1x128xf32>
    %48 = vector.broadcast %47 : vector<1x128xf32> to vector<16x128xf32>
    %49 = arith.addf %46, %48 : vector<16x128xf32>
    %cst_32 = arith.constant 0.000000e+00 : f32
    %50 = vector.broadcast %cst_32 : f32 to vector<16x128xf32>
    %51 = arith.cmpf ogt, %49, %50 : vector<16x128xf32>
    %cst_33 = arith.constant 2.000000e-01 : f32
    %52 = vector.broadcast %cst_33 : f32 to vector<16x128xf32>
    %53 = arith.mulf %52, %49 : vector<16x128xf32>
    %54 = arith.select %51, %49, %53 : vector<16x128xi1>, vector<16x128xf32>
    %c0_34 = arith.constant 0 : index
    %c0_35 = arith.constant 0 : index
    %55 = vector.load %arg11[%c0_34, %c0_35] : memref<128x128xf32, #tpu.memory_space<vmem>>, vector<128x128xf32>
    %cst_36 = arith.constant dense<0.000000e+00> : vector<16x128xf32>
    %56 = tpu.matmul %54, %55, %cst_36 {dimension_numbers = #tpu.dot_dimension_numbers<[1], [0], [0], [1], [0, 0, 1, 1], [], []>} : vector<16x128xf32>, vector<128x128xf32>, vector<16x128xf32> -> vector<16x128xf32>
    %c0_37 = arith.constant 0 : index
    %c0_38 = arith.constant 0 : index
    %57 = vector.load %arg12[%c0_37, %c0_38] : memref<1x128xf32, #tpu.memory_space<vmem>>, vector<1x128xf32>
    %58 = vector.broadcast %57 : vector<1x128xf32> to vector<16x128xf32>
    %59 = arith.addf %56, %58 : vector<16x128xf32>
    %cst_39 = arith.constant 0.000000e+00 : f32
    %60 = vector.broadcast %cst_39 : f32 to vector<16x128xf32>
    %61 = arith.cmpf ogt, %59, %60 : vector<16x128xf32>
    %cst_40 = arith.constant 2.000000e-01 : f32
    %62 = vector.broadcast %cst_40 : f32 to vector<16x128xf32>
    %63 = arith.mulf %62, %59 : vector<16x128xf32>
    %64 = arith.select %61, %59, %63 : vector<16x128xi1>, vector<16x128xf32>
    %c0_41 = arith.constant 0 : index
    %c0_42 = arith.constant 0 : index
    %65 = vector.load %arg13[%c0_41, %c0_42] : memref<128x128xf32, #tpu.memory_space<vmem>>, vector<128x128xf32>
    %cst_43 = arith.constant dense<0.000000e+00> : vector<16x128xf32>
    %66 = tpu.matmul %64, %65, %cst_43 {dimension_numbers = #tpu.dot_dimension_numbers<[1], [0], [0], [1], [0, 0, 1, 1], [], []>} : vector<16x128xf32>, vector<128x128xf32>, vector<16x128xf32> -> vector<16x128xf32>
    %c0_44 = arith.constant 0 : index
    %c0_45 = arith.constant 0 : index
    %67 = vector.load %arg14[%c0_44, %c0_45] : memref<1x128xf32, #tpu.memory_space<vmem>>, vector<1x128xf32>
    %68 = vector.broadcast %67 : vector<1x128xf32> to vector<16x128xf32>
    %69 = arith.addf %66, %68 : vector<16x128xf32>
    %70 = arith.negf %69 : vector<16x128xf32>
    %71 = math.exp %70 : vector<16x128xf32>
    %cst_46 = arith.constant 1.000000e+00 : f32
    %72 = vector.broadcast %cst_46 : f32 to vector<16x128xf32>
    %73 = arith.addf %72, %71 : vector<16x128xf32>
    %74 = arith.divf %72, %73 : vector<16x128xf32>
    %c0_47 = arith.constant 0 : index
    %c0_48 = arith.constant 0 : index
    %75 = vector.load %arg15[%c0_47, %c0_48] : memref<16x128xf32, #tpu.memory_space<vmem>>, vector<16x128xf32>
    tpu.vector_store %arg15[%c0_47, %c0_48], %74 {strides = array<i32>} : memref<16x128xf32, #tpu.memory_space<vmem>>, vector<16x128xf32>,
    return
  }
  func.func @transform_0(%arg0: i32) -> (i32, i32) {
    %c0_i32 = arith.constant 0 : i32
    %c0_i32_0 = arith.constant 0 : i32
    return %arg0, %c0_i32 : i32, i32
  }
  func.func @transform_1(%arg0: i32) -> (i32, i32) {
    %c0_i32 = arith.constant 0 : i32
    %c0_i32_0 = arith.constant 0 : i32
    return %arg0, %c0_i32 : i32, i32
  }
  func.func @transform_2(%arg0: i32) -> (i32, i32) {
    %c0_i32 = arith.constant 0 : i32
    %c0_i32_0 = arith.constant 0 : i32
    %c0_i32_1 = arith.constant 0 : i32
    return %c0_i32, %c0_i32_0 : i32, i32
  }
  func.func @transform_3(%arg0: i32) -> (i32, i32) {
    %c0_i32 = arith.constant 0 : i32
    %c0_i32_0 = arith.constant 0 : i32
    %c0_i32_1 = arith.constant 0 : i32
    return %c0_i32, %c0_i32_0 : i32, i32
  }
  func.func @transform_4(%arg0: i32) -> (i32, i32) {
    %c0_i32 = arith.constant 0 : i32
    %c0_i32_0 = arith.constant 0 : i32
    %c0_i32_1 = arith.constant 0 : i32
    return %c0_i32, %c0_i32_0 : i32, i32
  }
  func.func @transform_5(%arg0: i32) -> (i32, i32) {
    %c0_i32 = arith.constant 0 : i32
    %c0_i32_0 = arith.constant 0 : i32
    %c0_i32_1 = arith.constant 0 : i32
    return %c0_i32, %c0_i32_0 : i32, i32
  }
  func.func @transform_6(%arg0: i32) -> (i32, i32) {
    %c0_i32 = arith.constant 0 : i32
    %c0_i32_0 = arith.constant 0 : i32
    %c0_i32_1 = arith.constant 0 : i32
    return %c0_i32, %c0_i32_0 : i32, i32
  }
  func.func @transform_7(%arg0: i32) -> (i32, i32) {
    %c0_i32 = arith.constant 0 : i32
    %c0_i32_0 = arith.constant 0 : i32
    %c0_i32_1 = arith.constant 0 : i32
    return %c0_i32, %c0_i32_0 : i32, i32
  }
  func.func @transform_8(%arg0: i32) -> (i32, i32) {
    %c0_i32 = arith.constant 0 : i32
    %c0_i32_0 = arith.constant 0 : i32
    %c0_i32_1 = arith.constant 0 : i32
    return %c0_i32, %c0_i32_0 : i32, i32
  }
  func.func @transform_9(%arg0: i32) -> (i32, i32) {
    %c0_i32 = arith.constant 0 : i32
    %c0_i32_0 = arith.constant 0 : i32
    %c0_i32_1 = arith.constant 0 : i32
    return %c0_i32, %c0_i32_0 : i32, i32
  }
  func.func @transform_10(%arg0: i32) -> (i32, i32) {
    %c0_i32 = arith.constant 0 : i32
    %c0_i32_0 = arith.constant 0 : i32
    %c0_i32_1 = arith.constant 0 : i32
    return %c0_i32, %c0_i32_0 : i32, i32
  }
  func.func @transform_11(%arg0: i32) -> (i32, i32) {
    %c0_i32 = arith.constant 0 : i32
    %c0_i32_0 = arith.constant 0 : i32
    %c0_i32_1 = arith.constant 0 : i32
    return %c0_i32, %c0_i32_0 : i32, i32
  }
  func.func @transform_12(%arg0: i32) -> (i32, i32) {
    %c0_i32 = arith.constant 0 : i32
    %c0_i32_0 = arith.constant 0 : i32
    %c0_i32_1 = arith.constant 0 : i32
    return %c0_i32, %c0_i32_0 : i32, i32
  }
  func.func @transform_13(%arg0: i32) -> (i32, i32) {
    %c0_i32 = arith.constant 0 : i32
    %c0_i32_0 = arith.constant 0 : i32
    %c0_i32_1 = arith.constant 0 : i32
    return %c0_i32, %c0_i32_0 : i32, i32
  }
  func.func @transform_14(%arg0: i32) -> (i32, i32) {
    %c0_i32 = arith.constant 0 : i32
    %c0_i32_0 = arith.constant 0 : i32
    return %arg0, %c0_i32 : i32, i32
  }
  func.func @transform_15(%arg0: i32) -> (i32, i32) {
    %c0_i32 = arith.constant 0 : i32
    %c0_i32_0 = arith.constant 0 : i32
    return %arg0, %c0_i32 : i32, i32
  }
}

</mosaic_0001>

<bundles_post_ra>
// kernel: vae_forward.1
= control target key start
LH: loop header
LB: loop body
LE: loop exit
PB: predicated region body
PF: predicated region fallthrough
CT: control target
= control target key end

     0   :  { %s1495_s0 = inlined_call_operand.vmem [shape: f32[16,128], index: 0, kind: input, shape index: {}]   ;;  %s1496_s1 = inlined_call_operand.vmem [shape: f32[16,128], index: 1, kind: input, shape index: {}]   ;;  %s1497_s2 = inlined_call_operand.vmem [shape: f32[128,128], index: 2, kind: input, shape index: {}]   ;;  %s1498_s3 = inlined_call_operand.vmem [shape: f32[1,128], index: 3, kind: input, shape index: {}]   ;;  %s1499_s4 = inlined_call_operand.vmem [shape: f32[128,128], index: 4, kind: input, shape index: {}]   ;;  %s1500_s5 = inlined_call_operand.vmem [shape: f32[1,128], index: 5, kind: input, shape index: {}]   ;;  %s1501_s6 = inlined_call_operand.vmem [shape: f32[128,128], index: 6, kind: input, shape index: {}]   ;;  %s1502_s7 = inlined_call_operand.vmem [shape: f32[1,128], index: 7, kind: input, shape index: {}]   ;;  %s1503_s8 = inlined_call_operand.vmem [shape: f32[128,128], index: 8, kind: input, shape index: {}]   ;;  %s1504_s9 = inlined_call_operand.vmem [shape: f32[1,128], index: 9, kind: input, shape index: {}]   ;;  %s1505_s10 = inlined_call_operand.vmem [shape: f32[128,128], index: 10, kind: input, shape index: {}]   ;;  %s1506_s11 = inlined_call_operand.vmem [shape: f32[1,128], index: 11, kind: input, shape index: {}]   ;;  %s1507_s12 = inlined_call_operand.vmem [shape: f32[128,128], index: 12, kind: input, shape index: {}]   ;;  %s1508_s13 = inlined_call_operand.vmem [shape: f32[1,128], index: 13, kind: input, shape index: {}]   ;;  %s1509_s14 = inlined_call_operand.hbm [shape: f32[16,128], index: 14, kind: output, shape index: {0}]   ;;  %s1510_s15 = inlined_call_operand.vmem [shape: f32[16,128], index: 15, kind: output, shape index: {1}]  }
   0x1   :  { %v67_v0 = vld [vmem:[%s1497_s2 + $0x78] sm:$0xff]  ;;  %v66_v1 = vld [vmem:[%s1497_s2 + $0x70] sm:$0xff]  ;;  %v65_v2 = vld [vmem:[%s1497_s2 + $0x68] sm:$0xff] }
   0x2   :  { %838 = vmatprep.subr.mxu0 %v67_v0  ;;  %v64_v3 = vld [vmem:[%s1497_s2 + $0x60] sm:$0xff]  ;;  %v63_v5 = vld [vmem:[%s1497_s2 + $0x58] sm:$0xff]  ;;  %v170_v7 = vld [vmem:[%s1499_s4 + $0x70] sm:$0xff] }
   0x3   :  { %839 = vmatpush3.msra.mxu0 %v67_v0  ;;  %v50_v4 = vld [vmem:[%s1495_s0] sm:$0xff]  ;;  %v171_v6 = vld [vmem:[%s1499_s4 + $0x78] sm:$0xff]  ;;  %v62_v8 = vld [vmem:[%s1497_s2 + $0x50] sm:$0xff] }
   0x4   :  { %840 = vmatprep.subr.mxu0 %v66_v1  ;;  %870 = vmatprep.mubr.f32.mxu0 %v50_v4  ;;  %v169_v9 = vld [vmem:[%s1499_s4 + $0x68] sm:$0xff]  ;;  %v168_v11 = vld [vmem:[%s1499_s4 + $0x60] sm:$0xff] }
   0x5   :  { %841 = vmatpush3.msra.mxu0 %v66_v1  ;;  %873 = vmatprep.subr.mxu1 %v171_v6  ;;  %v61_v10 = vld [vmem:[%s1497_s2 + $0x48] sm:$0xff] }
   0x6   :  { %842 = vmatprep.subr.mxu0 %v65_v2  ;;  %874 = vmatpush3.msra.mxu1 %v171_v6 }
   0x7   :  { %843 = vmatpush3.msra.mxu0 %v65_v2  ;;  %875 = vmatprep.subr.mxu1 %v170_v7 }
   0x8   :  { %844 = vmatprep.subr.mxu0 %v64_v3  ;;  %876 = vmatpush3.msra.mxu1 %v170_v7 }
   0x9   :  { %845 = vmatpush3.msra.mxu0 %v64_v3 }
   0xa   :  { %846 = vmatprep.subr.mxu0 %v63_v5 }
   0xb   :  { %847 = vmatpush3.msra.mxu0 %v63_v5 }
   0xc   :  { %21 = vsyncpa [#allocation3], 0  ;;  %848 = vmatprep.subr.mxu0 %v62_v8  ;;  %877 = vmatprep.subr.mxu1 %v169_v9  ;;  %v60_v12 = vld [vmem:[%s1497_s2 + $0x40] sm:$0xff]  ;;  %v167_v13 = vld [vmem:[%s1499_s4 + $0x58] sm:$0xff] }
   0xd   :  { %849 = vmatpush3.msra.mxu0 %v62_v8  ;;  %878 = vmatpush3.msra.mxu1 %v169_v9  ;;  %v59_v14 = vld [vmem:[%s1497_s2 + $0x38] sm:$0xff]  ;;  %v166_v15 = vld [vmem:[%s1499_s4 + $0x50] sm:$0xff]  ;;  %v165_v17 = vld [vmem:[%s1499_s4 + $0x48] sm:$0xff] }
   0xe   :  { %850 = vmatprep.subr.mxu0 %v61_v10  ;;  %879 = vmatprep.subr.mxu1 %v168_v11  ;;  %v58_v16 = vld [vmem:[%s1497_s2 + $0x30] sm:$0xff]  ;;  %v57_v18 = vld [vmem:[%s1497_s2 + $0x28] sm:$0xff]  ;;  %v164_v19 = vld [vmem:[%s1499_s4 + $0x40] sm:$0xff] }
   0xf   :  { %851 = vmatpush3.msra.mxu0 %v61_v10  ;;  %880 = vmatpush3.msra.mxu1 %v168_v11  ;;  %v56_v20 = vld [vmem:[%s1497_s2 + $0x20] sm:$0xff]  ;;  %v163_v21 = vld [vmem:[%s1499_s4 + $0x38] sm:$0xff]  ;;  %v162_v23 = vld [vmem:[%s1499_s4 + $0x30] sm:$0xff] }
  0x10   :  { %852 = vmatprep.subr.mxu0 %v60_v12  ;;  %881 = vmatprep.subr.mxu1 %v167_v13  ;;  %v55_v22 = vld [vmem:[%s1497_s2 + $0x18] sm:$0xff]  ;;  %v54_v24 = vld [vmem:[%s1497_s2 + $0x10] sm:$0xff]  ;;  %v161_v25 = vld [vmem:[%s1499_s4 + $0x28] sm:$0xff] }
  0x11   :  { %853 = vmatpush3.msra.mxu0 %v60_v12  ;;  %882 = vmatpush3.msra.mxu1 %v167_v13  ;;  %v53_v26 = vld [vmem:[%s1497_s2 + $0x8] sm:$0xff]  ;;  %v160_v27 = vld [vmem:[%s1499_s4 + $0x20] sm:$0xff]  ;;  %v159_v30 = vld [vmem:[%s1499_s4 + $0x18] sm:$0xff] }
  0x12   :  { %854 = vmatprep.subr.mxu0 %v59_v14  ;;  %883 = vmatprep.subr.mxu1 %v166_v15  ;;  %v52_v28 = vld [vmem:[%s1497_s2] sm:$0xff]  ;;  %v51_v29 = vld [vmem:[%s1495_s0 + $0x8] sm:$0xff]  ;;  %v158_v31 = vld [vmem:[%s1499_s4 + $0x10] sm:$0xff] }
  0x13   :  { %855 = vmatpush3.msra.mxu0 %v59_v14  ;;  %884 = vmatpush3.msra.mxu1 %v166_v15  ;;  %v157_v32 = vld [vmem:[%s1499_s4 + $0x8] sm:$0xff]  ;;  %v156_v33 = vld [vmem:[%s1499_s4] sm:$0xff]  ;;  %v275_v34 = vld [vmem:[%s1501_s6 + $0x78] sm:$0xff] }
  0x14   :  { %856 = vmatprep.subr.mxu0 %v58_v16  ;;  %885 = vmatprep.subr.mxu1 %v165_v17  ;;  %v274_v35 = vld [vmem:[%s1501_s6 + $0x70] sm:$0xff]  ;;  %v273_v36 = vld [vmem:[%s1501_s6 + $0x68] sm:$0xff]  ;;  %v272_v37 = vld [vmem:[%s1501_s6 + $0x60] sm:$0xff] }
  0x15   :  { %857 = vmatpush3.msra.mxu0 %v58_v16  ;;  %886 = vmatpush3.msra.mxu1 %v165_v17  ;;  %v271_v38 = vld [vmem:[%s1501_s6 + $0x58] sm:$0xff]  ;;  %v270_v39 = vld [vmem:[%s1501_s6 + $0x50] sm:$0xff]  ;;  %v269_v40 = vld [vmem:[%s1501_s6 + $0x48] sm:$0xff] }
  0x16   :  { %858 = vmatprep.subr.mxu0 %v57_v18  ;;  %887 = vmatprep.subr.mxu1 %v164_v19  ;;  %v268_v41 = vld [vmem:[%s1501_s6 + $0x40] sm:$0xff]  ;;  %v267_v42 = vld [vmem:[%s1501_s6 + $0x38] sm:$0xff]  ;;  %v266_v43 = vld [vmem:[%s1501_s6 + $0x30] sm:$0xff] }
  0x17   :  { %859 = vmatpush3.msra.mxu0 %v57_v18  ;;  %888 = vmatpush3.msra.mxu1 %v164_v19  ;;  %v265_v44 = vld [vmem:[%s1501_s6 + $0x28] sm:$0xff]  ;;  %v264_v45 = vld [vmem:[%s1501_s6 + $0x20] sm:$0xff]  ;;  %v263_v55 = vld [vmem:[%s1501_s6 + $0x18] sm:$0xff] }
  0x18   :  { %860 = vmatprep.subr.mxu0 %v56_v20  ;;  %889 = vmatprep.subr.mxu1 %v163_v21  ;;  %v722_v46 = vld [vmem:[%s1498_s3] ss:$0 sm:$0xff]  ;;  %v262_v56 = vld [vmem:[%s1501_s6 + $0x10] sm:$0xff]  ;;  %v261_v57 = vld [vmem:[%s1501_s6 + $0x8] sm:$0xff] }
  0x19   :  { %861 = vmatpush3.msra.mxu0 %v56_v20  ;;  %890 = vmatpush3.msra.mxu1 %v163_v21  ;;  %v260_v58 = vld [vmem:[%s1501_s6] sm:$0xff]  ;;  %v397_v59 = vld [vmem:[%s1503_s8 + $0x78] sm:$0xff]  ;;  %v396_v60 = vld [vmem:[%s1503_s8 + $0x70] sm:$0xff] }
  0x1a   :  { %862 = vmatprep.subr.mxu0 %v55_v22  ;;  %891 = vmatprep.subr.mxu1 %v162_v23  ;;  %v723_v61 = vld [vmem:[%s1500_s5] ss:$0 sm:$0xff]  ;;  %v395_v6 = vld [vmem:[%s1503_s8 + $0x68] sm:$0xff]  ;;  %v393_v8 = vld [vmem:[%s1503_s8 + $0x58] sm:$0xff] }
  0x1b   :  { %863 = vmatpush3.msra.mxu0 %v55_v22  ;;  %892 = vmatpush3.msra.mxu1 %v162_v23  ;;  %v394_v7 = vld [vmem:[%s1503_s8 + $0x60] sm:$0xff]  ;;  %v392_v9 = vld [vmem:[%s1503_s8 + $0x50] sm:$0xff]  ;;  %v391_v10 = vld [vmem:[%s1503_s8 + $0x48] sm:$0xff] }
  0x1c   :  { %864 = vmatprep.subr.mxu0 %v54_v24  ;;  %893 = vmatprep.subr.mxu1 %v161_v25  ;;  %v390_v11 = vld [vmem:[%s1503_s8 + $0x40] sm:$0xff]  ;;  %v389_v12 = vld [vmem:[%s1503_s8 + $0x38] sm:$0xff]  ;;  %v388_v13 = vld [vmem:[%s1503_s8 + $0x30] sm:$0xff] }
  0x1d   :  { %865 = vmatpush3.msra.mxu0 %v54_v24  ;;  %894 = vmatpush3.msra.mxu1 %v161_v25  ;;  %v387_v14 = vld [vmem:[%s1503_s8 + $0x28] sm:$0xff]  ;;  %v386_v15 = vld [vmem:[%s1503_s8 + $0x20] sm:$0xff]  ;;  %v385_v16 = vld [vmem:[%s1503_s8 + $0x18] sm:$0xff] }
  0x1e   :  { %866 = vmatprep.subr.mxu0 %v53_v26  ;;  %895 = vmatprep.subr.mxu1 %v160_v27  ;;  %v384_v17 = vld [vmem:[%s1503_s8 + $0x10] sm:$0xff]  ;;  %v383_v18 = vld [vmem:[%s1503_s8 + $0x8] sm:$0xff]  ;;  %v382_v19 = vld [vmem:[%s1503_s8] sm:$0xff] }
  0x1f   :  { %867 = vmatpush3.msra.mxu0 %v53_v26  ;;  %896 = vmatpush3.msra.mxu1 %v160_v27  ;;  %v501_v20 = vld [vmem:[%s1505_s10 + $0x78] sm:$0xff]  ;;  %v500_v21 = vld [vmem:[%s1505_s10 + $0x70] sm:$0xff]  ;;  %v499_v22 = vld [vmem:[%s1505_s10 + $0x68] sm:$0xff] }
  0x20   :  { %868 = vmatprep.subr.mxu0 %v52_v28  ;;  %897 = vmatprep.subr.mxu1 %v159_v30  ;;  %v498_v23 = vld [vmem:[%s1505_s10 + $0x60] sm:$0xff]  ;;  %v497_v24 = vld [vmem:[%s1505_s10 + $0x58] sm:$0xff]  ;;  %v496_v25 = vld [vmem:[%s1505_s10 + $0x50] sm:$0xff] }
  0x21   :  { %869 = vmatpush3.msra.mxu0 %v52_v28  ;;  %898 = vmatpush3.msra.mxu1 %v159_v30  ;;  %v495_v26 = vld [vmem:[%s1505_s10 + $0x48] sm:$0xff]  ;;  %v494_v27 = vld [vmem:[%s1505_s10 + $0x40] sm:$0xff]  ;;  %v493_v28 = vld [vmem:[%s1505_s10 + $0x38] sm:$0xff] }
  0x22   :  { %871 = vmatmul.mubr.f32.vlgmr.msra.gmra.mxu0 %v51_v29  ;;  %899 = vmatprep.subr.mxu1 %v158_v31  ;;  %v492_v29 = vld [vmem:[%s1505_s10 + $0x30] sm:$0xff]  ;;  %v491_v30 = vld [vmem:[%s1505_s10 + $0x28] sm:$0xff] }
  0x23   :  { %900 = vmatpush3.msra.mxu1 %v158_v31  ;;  %908 = vmatprep.subr.mxu0 %v275_v34  ;;  %v490_v31 = vld [vmem:[%s1505_s10 + $0x20] sm:$0xff] }
  0x24   :  { %901 = vmatprep.subr.mxu1 %v157_v32  ;;  %909 = vmatpush3.msra.mxu0 %v275_v34  ;;  %v724_v34 = vld [vmem:[%s1502_s7] ss:$0 sm:$0xff] }
  0x25   :  { %902 = vmatpush3.msra.mxu1 %v157_v32  ;;  %910 = vmatprep.subr.mxu0 %v274_v35  ;;  %v360_v32 = vlaneseq }
  0x26   :  { %903 = vmatprep.subr.mxu1 %v156_v33  ;;  %911 = vmatpush3.msra.mxu0 %v274_v35 }
  0x27   :  { %904 = vmatpush3.msra.mxu1 %v156_v33  ;;  %912 = vmatprep.subr.mxu0 %v273_v36  ;;  %v361_v33 = vand.u32 127, %v360_v32 }
  0x28   :  { %913 = vmatpush3.msra.mxu0 %v273_v36  ;;  %943 = vmatprep.subr.mxu1 %v397_v59 }
  0x29   :  { %914 = vmatprep.subr.mxu0 %v272_v37  ;;  %vm365_vm4 = vcmp.ge.s32.totalorder %v361_v33, 32  ;;  %vm366_vm5 = vcmp.lt.s32.totalorder %v361_v33, 64  ;;  %vm362_vm7 = vcmp.lt.s32.totalorder %v361_v33, 32 }
  0x2a   :  { %915 = vmatpush3.msra.mxu0 %v272_v37  ;;  %vm367_vm6 = vmand %vm365_vm4, %vm366_vm5 }
  0x2b   :  { %916 = vmatprep.subr.mxu0 %v271_v38 }
  0x2c   :  { %917 = vmatpush3.msra.mxu0 %v271_v38 }
  0x2d   :  { %918 = vmatprep.subr.mxu0 %v270_v39 }
  0x2e   :  { %919 = vmatpush3.msra.mxu0 %v270_v39 }
  0x2f   :  { %920 = vmatprep.subr.mxu0 %v269_v40 }
  0x30   :  { %921 = vmatpush3.msra.mxu0 %v269_v40 }
  0x31   :  { %922 = vmatprep.subr.mxu0 %v268_v41 }
  0x32   :  { %923 = vmatpush3.msra.mxu0 %v268_v41 }
  0x33   :  { %924 = vmatprep.subr.mxu0 %v267_v42 }
  0x34   :  { %925 = vmatpush3.msra.mxu0 %v267_v42 }
  0x35   :  { %926 = vmatprep.subr.mxu0 %v266_v43 }
  0x36   :  { %927 = vmatpush3.msra.mxu0 %v266_v43 }
  0x37   :  { %928 = vmatprep.subr.mxu0 %v265_v44 }
  0x38   :  { %929 = vmatpush3.msra.mxu0 %v265_v44 }
  0x39   :  { %930 = vmatprep.subr.mxu0 %v264_v45 }
  0x3a   :  { %931 = vmatpush3.msra.mxu0 %v264_v45  ;;  %v377_v45 = vld [vmem:[%s1496_s1 + $0x8] sm:$0xff] }
  0x3b   :  { %932 = vmatprep.subr.mxu0 %v263_v55 }
  0x3c   :  { %933 = vmatpush3.msra.mxu0 %v263_v55  ;;  %v489_v55 = vld [vmem:[%s1505_s10 + $0x18] sm:$0xff] }
  0x3d   :  { %934 = vmatprep.subr.mxu0 %v262_v56 }
  0x3e   :  { %935 = vmatpush3.msra.mxu0 %v262_v56  ;;  %v488_v56 = vld [vmem:[%s1505_s10 + $0x10] sm:$0xff] }
  0x3f   :  { %936 = vmatprep.subr.mxu0 %v261_v57 }
  0x40   :  { %937 = vmatpush3.msra.mxu0 %v261_v57  ;;  %v487_v57 = vld [vmem:[%s1505_s10 + $0x8] sm:$0xff] }
  0x41   :  { %938 = vmatprep.subr.mxu0 %v260_v58 }
  0x42   :  { %939 = vmatpush3.msra.mxu0 %v260_v58  ;;  %v486_v58 = vld [vmem:[%s1505_s10] sm:$0xff] }
  0x43   :  { %978 = vmatprep.subr.mxu0 %v501_v20 }
  0xe2   :  { %v872_v47 = vpop.f32.mrf.mxu0 }
  0xe3   :  { %v147_v48 = vadd.f32 %v872_v47, %v722_v46  ;;  %v376_v47 = vld [vmem:[%s1496_s1] sm:$0xff] }
  0xe4   :  { %v141_v49 = vpop.f32.mrf.mxu0 }
  0xe5   :  { %v142_v50 = vadd.f32 %v722_v46, %v141_v49  ;;  %v153_v51 = vmul.f32 0.2, %v147_v48  ;;  %vm151_vm1 = vcmp.gt.f32.partialorder %v147_v48, 0.0 }
  0xe7   :  { %vm150_vm0 = vcmp.gt.f32.partialorder %v142_v50, 0.0  ;;  %v152_v52 = vmul.f32 0.2, %v142_v50  ;;  %v155_v54 = vsel %vm151_vm1, %v147_v48, %v153_v51 }
  0xe9   :  { %v154_v53 = vsel %vm150_vm0, %v142_v50, %v152_v52 }
  0xea   :  { %905 = vmatprep.mubr.f32.mxu1 %v154_v53 }
  0xeb   :  { %906 = vmatmul.mubr.f32.vlgmr.msra.gmra.mxu1 %v155_v54 }
  0xec   :  { %944 = vmatpush3.msra.mxu1 %v397_v59  ;;  %v605_v59 = vld [vmem:[%s1507_s12 + $0x78] sm:$0xff] }
  0xed   :  { %945 = vmatprep.subr.mxu1 %v396_v60 }
  0xee   :  { %946 = vmatpush3.msra.mxu1 %v396_v60  ;;  %v604_v60 = vld [vmem:[%s1507_s12 + $0x70] sm:$0xff] }
  0xef   :  { %947 = vmatprep.subr.mxu1 %v395_v6 }
  0xf0   :  { %948 = vmatpush3.msra.mxu1 %v395_v6  ;;  %v594_v6 = vld [vmem:[%s1507_s12 + $0x20] sm:$0xff] }
  0xf1   :  { %949 = vmatprep.subr.mxu1 %v394_v7 }
  0xf2   :  { %950 = vmatpush3.msra.mxu1 %v394_v7  ;;  %v725_v7 = vld [vmem:[%s1504_s9] ss:$0 sm:$0xff] }
  0xf3   :  { %951 = vmatprep.subr.mxu1 %v393_v8 }
  0xf4   :  { %952 = vmatpush3.msra.mxu1 %v393_v8 }
  0xf5   :  { %953 = vmatprep.subr.mxu1 %v392_v9 }
  0xf6   :  { %954 = vmatpush3.msra.mxu1 %v392_v9 }
  0xf7   :  { %955 = vmatprep.subr.mxu1 %v391_v10 }
  0xf8   :  { %956 = vmatpush3.msra.mxu1 %v391_v10 }
  0xf9   :  { %957 = vmatprep.subr.mxu1 %v390_v11 }
  0xfa   :  { %958 = vmatpush3.msra.mxu1 %v390_v11 }
  0xfb   :  { %959 = vmatprep.subr.mxu1 %v389_v12 }
  0xfc   :  { %960 = vmatpush3.msra.mxu1 %v389_v12 }
  0xfd   :  { %961 = vmatprep.subr.mxu1 %v388_v13 }
  0xfe   :  { %962 = vmatpush3.msra.mxu1 %v388_v13 }
  0xff   :  { %963 = vmatprep.subr.mxu1 %v387_v14 }
 0x100   :  { %964 = vmatpush3.msra.mxu1 %v387_v14 }
 0x101   :  { %965 = vmatprep.subr.mxu1 %v386_v15 }
 0x102   :  { %966 = vmatpush3.msra.mxu1 %v386_v15 }
 0x103   :  { %967 = vmatprep.subr.mxu1 %v385_v16 }
 0x104   :  { %968 = vmatpush3.msra.mxu1 %v385_v16  ;;  %v593_v16 = vld [vmem:[%s1507_s12 + $0x18] sm:$0xff] }
 0x105   :  { %969 = vmatprep.subr.mxu1 %v384_v17 }
 0x106   :  { %970 = vmatpush3.msra.mxu1 %v384_v17  ;;  %v592_v17 = vld [vmem:[%s1507_s12 + $0x10] sm:$0xff] }
 0x107   :  { %971 = vmatprep.subr.mxu1 %v383_v18 }
 0x108   :  { %972 = vmatpush3.msra.mxu1 %v383_v18  ;;  %v591_v18 = vld [vmem:[%s1507_s12 + $0x8] sm:$0xff] }
 0x109   :  { %973 = vmatprep.subr.mxu1 %v382_v19 }
 0x10a   :  { %974 = vmatpush3.msra.mxu1 %v382_v19  ;;  %v590_v19 = vld [vmem:[%s1507_s12] sm:$0xff] }
 0x10b   :  { %1013 = vmatprep.subr.mxu1 %v605_v59 }
 0x1ab   :  { %v907_v62 = vpop.f32.mrf.mxu1 }
 0x1ac   :  { %v251_v63 = vadd.f32 %v907_v62, %v723_v61  ;;  %v602_v62 = vld [vmem:[%s1507_s12 + $0x60] sm:$0xff] }
 0x1ad   :  { %v245_v0 = vpop.f32.mrf.mxu1 }
 0x1ae   :  { %v246_v1 = vadd.f32 %v723_v61, %v245_v0  ;;  %v257_v2 = vmul.f32 0.2, %v251_v63  ;;  %vm255_vm2 = vcmp.gt.f32.partialorder %v251_v63, 0.0  ;;  %v603_v61 = vld [vmem:[%s1507_s12 + $0x68] sm:$0xff]  ;;  %v600_v0 = vld [vmem:[%s1507_s12 + $0x50] sm:$0xff] }
 0x1b0   :  { %v256_v3 = vmul.f32 0.2, %v246_v1  ;;  %vm254_vm3 = vcmp.gt.f32.partialorder %v246_v1, 0.0  ;;  %v259_v5 = vsel %vm255_vm2, %v251_v63, %v257_v2  ;;  %v601_v63 = vld [vmem:[%s1507_s12 + $0x58] sm:$0xff]  ;;  %v598_v2 = vld [vmem:[%s1507_s12 + $0x40] sm:$0xff] }
 0x1b2   :  { %v258_v4 = vsel %vm254_vm3, %v246_v1, %v256_v3  ;;  %v599_v1 = vld [vmem:[%s1507_s12 + $0x48] sm:$0xff]  ;;  %v597_v3 = vld [vmem:[%s1507_s12 + $0x38] sm:$0xff] }
 0x1b3   :  { %940 = vmatprep.mubr.f32.mxu0 %v258_v4  ;;  %v596_v4 = vld [vmem:[%s1507_s12 + $0x30] sm:$0xff] }
 0x1b4   :  { %941 = vmatmul.mubr.f32.vlgmr.msra.gmra.mxu0 %v259_v5  ;;  %v595_v5 = vld [vmem:[%s1507_s12 + $0x28] sm:$0xff] }
 0x1b5   :  { %979 = vmatpush3.msra.mxu0 %v501_v20  ;;  %v726_v20 = vld [vmem:[%s1506_s11] ss:$0 sm:$0xff]  ;;  %s1085_s11 = smov [#allocation2]  }
 0x1b6   :  { %980 = vmatprep.subr.mxu0 %v500_v21  ;;  %s707_s19 = sshll.u32 %s1085_s11, 4  ;;  %s708_s19 = int_to_ptr.vmem [resolvable:$true] %s707_s19 }
 0x1b7   :  { %981 = vmatpush3.msra.mxu0 %v500_v21  ;;  %p1068_p1 = scmp.lt.s32.totalorder %s708_s19, %s708_s19 }
 0x1b8   :  { %982 = vmatprep.subr.mxu0 %v499_v22 }
 0x1b9   :  { %983 = vmatpush3.msra.mxu0 %v499_v22 }
 0x1ba   :  { %984 = vmatprep.subr.mxu0 %v498_v23 }
 0x1bb   :  { %985 = vmatpush3.msra.mxu0 %v498_v23 }
 0x1bc   :  { %986 = vmatprep.subr.mxu0 %v497_v24 }
 0x1bd   :  { %987 = vmatpush3.msra.mxu0 %v497_v24 }
 0x1be   :  { %988 = vmatprep.subr.mxu0 %v496_v25 }
 0x1bf   :  { %989 = vmatpush3.msra.mxu0 %v496_v25 }
 0x1c0   :  { %990 = vmatprep.subr.mxu0 %v495_v26 }
 0x1c1   :  { %991 = vmatpush3.msra.mxu0 %v495_v26 }
 0x1c2   :  { %992 = vmatprep.subr.mxu0 %v494_v27 }
 0x1c3   :  { %993 = vmatpush3.msra.mxu0 %v494_v27 }
 0x1c4   :  { %994 = vmatprep.subr.mxu0 %v493_v28 }
 0x1c5   :  { %995 = vmatpush3.msra.mxu0 %v493_v28 }
 0x1c6   :  { %996 = vmatprep.subr.mxu0 %v492_v29 }
 0x1c7   :  { %997 = vmatpush3.msra.mxu0 %v492_v29  ;;  %v727_v29 = vld [vmem:[%s1508_s13] ss:$0 sm:$0xff]  ;;  %s1063_s13 = scalar_lea.vmem %s708_s19, 256 }
 0x1c8   :  { %998 = vmatprep.subr.mxu0 %v491_v30  ;;  %p1064_p0 = scmp.ne.s32.totalorder %s708_s19, %s1063_s13  ;;  %p1069_p2 = scmp.lt.s32.totalorder %s1063_s13, %s1063_s13 }
 0x1c9   :  { %999 = vmatpush3.msra.mxu0 %v491_v30 }
 0x1ca   :  { %1000 = vmatprep.subr.mxu0 %v490_v31  ;;  %p1070_p3 = por %p1069_p2, %p1068_p1 }
 0x1cb   :  { %1001 = vmatpush3.msra.mxu0 %v490_v31 }
 0x1cc   :  { %1002 = vmatprep.subr.mxu0 %v489_v55  ;;  %p1071_p4 = pnand %p1070_p3, %p1064_p0 }
 0x1cd   :  { %1003 = vmatpush3.msra.mxu0 %v489_v55 }
 0x1ce   :  { %1004 = vmatprep.subr.mxu0 %v488_v56 }
 0x1cf   :  { %1005 = vmatpush3.msra.mxu0 %v488_v56 }
 0x1d0   :  { %1006 = vmatprep.subr.mxu0 %v487_v57 }
 0x1d1   :  { %1007 = vmatpush3.msra.mxu0 %v487_v57 }
 0x1d2   :  { %1008 = vmatprep.subr.mxu0 %v486_v58 }
 0x1d3   :  { %1009 = vmatpush3.msra.mxu0 %v486_v58 }
 0x274   :  { %v942_v35 = vpop.f32.mrf.mxu0 }
 0x275   :  { %v355_v36 = vadd.f32 %v942_v35, %v724_v34 }
 0x276   :  { %v349_v37 = vpop.f32.mrf.mxu0 }
 0x277   :  { %359 = vst [vmem:[%s1510_s15 + $0x8] sm:$0xff] %v355_v36  ;;  %v369_v38 = vsel %vm367_vm6, %v355_v36, 0.0  ;;  %v350_v39 = vadd.f32 %v724_v34, %v349_v37  ;;  %v364_v52 = vsel %vm362_vm7, %v355_v36, 0.0 }
 0x278   :  { %v371_v40 = vmul.f32 0.5, %v369_v38 }
 0x279   :  { %358 = vst [vmem:[%s1510_s15] sm:$0xff] %v350_v39  ;;  %v368_v41 = vsel %vm367_vm6, %v350_v39, 0.0  ;;  %v363_v51 = vsel %vm362_vm7, %v350_v39, 0.0 }
 0x27a   :  { %v374_v42 = vmul.f32 1.442695, %v371_v40  ;;  %v370_v43 = vmul.f32 0.5, %v368_v41 }
 0x27c   :  { %1051 = vpow2.f32 %v374_v42  ;;  %v372_v44 = vmul.f32 1.442695, %v370_v43 }
 0x27e   :  { %1053 = vpow2.f32 %v372_v44 }
 0x289   :  { %v1052_v46 = vpop.eup %1051 }
 0x28a   :  { %v379_v49 = vmul.f32 %v1052_v46, %v377_v45 }
 0x28b   :  { %v1054_v48 = vpop.eup %1053 }
 0x28c   :  { %v378_v50 = vmul.f32 %v1054_v48, %v376_v47  ;;  %v381_v54 = vadd.f32 %v379_v49, %v364_v52 }
 0x28e   :  { %v380_v53 = vadd.f32 %v378_v50, %v363_v51 }
 0x290   :  { %975 = vmatprep.mubr.f32.mxu1 %v380_v53 }
 0x291   :  { %976 = vmatmul.mubr.f32.vlgmr.msra.gmra.mxu1 %v381_v54 }
 0x292   :  { %1014 = vmatpush3.msra.mxu1 %v605_v59 }
 0x293   :  { %1015 = vmatprep.subr.mxu1 %v604_v60 }
 0x294   :  { %1016 = vmatpush3.msra.mxu1 %v604_v60 }
 0x295   :  { %1017 = vmatprep.subr.mxu1 %v603_v61 }
 0x296   :  { %1018 = vmatpush3.msra.mxu1 %v603_v61 }
 0x297   :  { %1019 = vmatprep.subr.mxu1 %v602_v62 }
 0x298   :  { %1020 = vmatpush3.msra.mxu1 %v602_v62 }
 0x299   :  { %1021 = vmatprep.subr.mxu1 %v601_v63 }
 0x29a   :  { %1022 = vmatpush3.msra.mxu1 %v601_v63 }
 0x29b   :  { %1023 = vmatprep.subr.mxu1 %v600_v0 }
 0x29c   :  { %1024 = vmatpush3.msra.mxu1 %v600_v0 }
 0x29d   :  { %1025 = vmatprep.subr.mxu1 %v599_v1 }
 0x29e   :  { %1026 = vmatpush3.msra.mxu1 %v599_v1 }
 0x29f   :  { %1027 = vmatprep.subr.mxu1 %v598_v2 }
 0x2a0   :  { %1028 = vmatpush3.msra.mxu1 %v598_v2 }
 0x2a1   :  { %1029 = vmatprep.subr.mxu1 %v597_v3 }
 0x2a2   :  { %1030 = vmatpush3.msra.mxu1 %v597_v3 }
 0x2a3   :  { %1031 = vmatprep.subr.mxu1 %v596_v4 }
 0x2a4   :  { %1032 = vmatpush3.msra.mxu1 %v596_v4 }
 0x2a5   :  { %1033 = vmatprep.subr.mxu1 %v595_v5 }
 0x2a6   :  { %1034 = vmatpush3.msra.mxu1 %v595_v5 }
 0x2a7   :  { %1035 = vmatprep.subr.mxu1 %v594_v6 }
 0x2a8   :  { %1036 = vmatpush3.msra.mxu1 %v594_v6 }
 0x2a9   :  { %1037 = vmatprep.subr.mxu1 %v593_v16 }
 0x2aa   :  { %1038 = vmatpush3.msra.mxu1 %v593_v16 }
 0x2ab   :  { %1039 = vmatprep.subr.mxu1 %v592_v17 }
 0x2ac   :  { %1040 = vmatpush3.msra.mxu1 %v592_v17 }
 0x2ad   :  { %1041 = vmatprep.subr.mxu1 %v591_v18 }
 0x2ae   :  { %1042 = vmatpush3.msra.mxu1 %v591_v18 }
 0x2af   :  { %1043 = vmatprep.subr.mxu1 %v590_v19 }
 0x2b0   :  { %1044 = vmatpush3.msra.mxu1 %v590_v19 }
 0x351   :  { %v977_v8 = vpop.f32.mrf.mxu1 }
 0x352   :  { %v477_v9 = vadd.f32 %v977_v8, %v725_v7 }
 0x353   :  { %v471_v10 = vpop.f32.mrf.mxu1 }
 0x354   :  { %v472_v11 = vadd.f32 %v725_v7, %v471_v10  ;;  %v483_v12 = vmul.f32 0.2, %v477_v9  ;;  %vm481_vm8 = vcmp.gt.f32.partialorder %v477_v9, 0.0 }
 0x356   :  { %v482_v13 = vmul.f32 0.2, %v472_v11  ;;  %vm480_vm9 = vcmp.gt.f32.partialorder %v472_v11, 0.0  ;;  %v485_v15 = vsel %vm481_vm8, %v477_v9, %v483_v12 }
 0x358   :  { %v484_v14 = vsel %vm480_vm9, %v472_v11, %v482_v13 }
 0x359   :  { %1010 = vmatprep.mubr.f32.mxu0 %v484_v14 }
 0x35a   :  { %1011 = vmatmul.mubr.f32.vlgmr.msra.gmra.mxu0 %v485_v15 }
 0x41a   :  { %v1012_v21 = vpop.f32.mrf.mxu0 }
 0x41b   :  { %v581_v22 = vadd.f32 %v1012_v21, %v726_v20 }
 0x41c   :  { %v575_v23 = vpop.f32.mrf.mxu0 }
 0x41d   :  { %v576_v24 = vadd.f32 %v726_v20, %v575_v23  ;;  %v587_v25 = vmul.f32 0.2, %v581_v22  ;;  %vm585_vm10 = vcmp.gt.f32.partialorder %v581_v22, 0.0 }
 0x41f   :  { %v586_v26 = vmul.f32 0.2, %v576_v24  ;;  %vm584_vm11 = vcmp.gt.f32.partialorder %v576_v24, 0.0  ;;  %v589_v28 = vsel %vm585_vm10, %v581_v22, %v587_v25 }
 0x421   :  { %v588_v27 = vsel %vm584_vm11, %v576_v24, %v586_v26 }
 0x422   :  { %1045 = vmatprep.mubr.f32.mxu1 %v588_v27 }
 0x423   :  { %1046 = vmatmul.mubr.f32.vlgmr.msra.gmra.mxu1 %v589_v28 }
 0x4e3   :  { %v1047_v30 = vpop.f32.mrf.mxu1 }
 0x4e4   :  { %v685_v31 = vadd.f32 %v1047_v30, %v727_v29 }
 0x4e5   :  { %v679_v32 = vpop.f32.mrf.mxu1 }
 0x4e6   :  { %v729_v33 = vmul.f32 -1.442695, %v685_v31  ;;  %v680_v34 = vadd.f32 %v727_v29, %v679_v32 }
 0x4e8   :  { %1055 = vpow2.f32 %v729_v33  ;;  %v728_v35 = vmul.f32 -1.442695, %v680_v34 }
 0x4ea   :  { %1057 = vpow2.f32 %v728_v35 }
 0x4f5   :  { %v1056_v36 = vpop.eup %1055 }
 0x4f6   :  { %v695_v37 = vadd.f32 1.0, %v1056_v36 }
 0x4f7   :  { %v1058_v38 = vpop.eup %1057 }
 0x4f8   :  { %1059 = vrcp.f32 %v695_v37  ;;  %v694_v39 = vadd.f32 1.0, %v1058_v38 }
 0x4fa   :  { %1061 = vrcp.f32 %v694_v39 }
 0x505   :  { %v1060_v40 = vpop.eup %1059 }
 0x506   :  { %701 = vst [vmem:[#allocation2 + $0x8] sm:$0xff] %v1060_v40 }
 0x507   :  { %v1062_v41 = vpop.eup %1061 }
 0x508   :  { %700 = vst [vmem:[#allocation2] sm:$0xff] %v1062_v41 }
 0x509   :  { %1074 = shalt.err (!%p1071_p4)
}
 0x50a   :  { %s1086_s20 = smov 128   ;;  %s1087_s8 = smov 8  }
 0x50b   :  { %713 = dma.vmem_to_hbm [thread:$0]  %s708_s19, 256, %s1509_s14, [#allocation3], %s1086_s20, %s1086_s20, %s1087_s8  }
 0x50c   :  { %1083 = dma.done.wait [#allocation3], 256  }
 0x50d   :  { %1084 = vsyncadd [#allocation3], 4294967040 }
 0x50e   :  { %721 = vsyncpa [#allocation3], 1 }

</bundles_post_ra>
